<compile_context>
chip_gen: v5e
topology: v5e:2x2
jax: 0.10.0
libtpu: 0.0.40
codegen_flags: <defaults>
</compile_context>

<pallas_src>
import math
import functools

import jax
import jax.numpy as jnp
from jax import lax
from jax.experimental import pallas as pl
from jax.experimental.pallas import tpu as pltpu


# ---------------------------------------------------------------------------
# Rotary tables (tiny, computed once in plain JAX and passed to the kernel)
# ---------------------------------------------------------------------------
def rotary_tables(seq_len, head_dim, offset=0):
    """open_lm RotaryEmbedding cos/sin tables, shape (S, head_dim)."""
    inv_freq = 1.0 / (
        10000.0 ** (jnp.arange(0, head_dim, 2, dtype=jnp.float32) / head_dim)
    )
    t = jnp.arange(offset, offset + seq_len, dtype=jnp.float32)
    freqs = jnp.einsum("i,j->ij", t, inv_freq)          # (S, D/2)
    emb = jnp.concatenate([freqs, freqs], axis=-1)      # (S, D)
    return jnp.cos(emb), jnp.sin(emb)


# ---------------------------------------------------------------------------
# Fused kernel: in_proj -> rotary -> exact attention -> out_proj
# ---------------------------------------------------------------------------
def _fused_attn_kernel(x_ref, w_in_ref, w_out_ref, cos_ref, sin_ref, o_ref, *,
                       n_heads, head_dim, scale):
    dim = n_heads * head_dim
    x = x_ref[0]                      # (S, dim)       activations, lane-dense
    w_in = w_in_ref[...]              # (3*dim, dim)   native PyTorch (N, K) layout
    w_out = w_out_ref[...]            # (dim, dim)
    cos = cos_ref[...]                # (S, head_dim)
    sin = sin_ref[...]

    # in_proj: y = x @ w_in.T   (contract K axes directly; no transpose op)
    qkv = lax.dot_general(x, w_in, (((1,), (1,)), ((), ())),
                          preferred_element_type=jnp.float32)       # (S, 3*dim)

    half = head_dim // 2

    def rotate_half(u):                                  # (S, head_dim)
        u1 = u[:, :half]
        u2 = u[:, half:]
        return jnp.concatenate([-u2, u1], axis=-1)

    outs = []
    for h in range(n_heads):                             # static unroll over heads
        q = qkv[:, h * head_dim:(h + 1) * head_dim]
        k = qkv[:, dim + h * head_dim:dim + (h + 1) * head_dim]
        v = qkv[:, 2 * dim + h * head_dim:2 * dim + (h + 1) * head_dim]

        # rotary positional embedding (offset=0; cast is a no-op in f32)
        q = q * cos + rotate_half(q) * sin
        k = k * cos + rotate_half(k) * sin

        # exact non-causal softmax attention (HyperAttention short-seq fallback)
        s = lax.dot_general(q, k, (((1,), (1,)), ((), ())),
                            preferred_element_type=jnp.float32) * scale   # (S, S)
        m = jnp.max(s, axis=-1, keepdims=True)
        p = jnp.exp(s - m)
        denom = jnp.sum(p, axis=-1, keepdims=True)
        inv = pl.reciprocal(denom, approx=True)           # EUP, not VALU divide
        outs.append(jnp.dot(p, v, preferred_element_type=jnp.float32) * inv)

    attn = jnp.concatenate(outs, axis=-1)                 # (S, dim) lane-dense

    # out_proj: out = attn @ w_out.T
    out = lax.dot_general(attn, w_out, (((1,), (1,)), ((), ())),
                          preferred_element_type=jnp.float32)       # (S, dim)
    o_ref[0] = out.astype(o_ref.dtype)                    # single unmasked lane-dense store


def custom_openlm_attn_forward(x, w_in, w_out, n_heads):
    """Forward pass of CustomOpenLmAttn (hyper attn_method, short-seq exact path)."""
    B, S, dim = x.shape
    head_dim = dim // n_heads
    scale = head_dim ** (-0.5)
    cos, sin = rotary_tables(S, head_dim)

    kernel = functools.partial(
        _fused_attn_kernel, n_heads=n_heads, head_dim=head_dim, scale=scale
    )
    out = pl.pallas_call(
        kernel,
        out_shape=jax.ShapeDtypeStruct((B, S, dim), x.dtype),
        grid=(B,),
        in_specs=[
            pl.BlockSpec((1, S, dim), lambda b: (b, 0, 0)),        # activations per batch
            pl.BlockSpec((3 * dim, dim), lambda b: (0, 0)),        # weights resident across grid
            pl.BlockSpec((dim, dim), lambda b: (0, 0)),
            pl.BlockSpec((S, head_dim), lambda b: (0, 0)),
            pl.BlockSpec((S, head_dim), lambda b: (0, 0)),
        ],
        out_specs=pl.BlockSpec((1, S, dim), lambda b: (b, 0, 0)),
        compiler_params=pltpu.CompilerParams(
            dimension_semantics=("parallel",)
        ),
    )(x, w_in, w_out, cos, sin)

    past_key_value = None  # use_cache=False
    return out, past_key_value


# ---------------------------------------------------------------------------
# Parameter setup (matches reset_parameters(): trunc normal, +/- 3 std)
# ---------------------------------------------------------------------------
def init_params(key, dim, n_heads, layer_id):
    k_in, k_out = jax.random.split(key)
    std_in = 1.0 / math.sqrt(dim)
    std_out = std_in / math.sqrt(2 * (layer_id + 1))
    w_in = (
        jax.random.truncated_normal(k_in, -3.0, 3.0, (3 * dim, dim), jnp.float32)
        * std_in
    )
    w_out = (
        jax.random.truncated_normal(k_out, -3.0, 3.0, (dim, dim), jnp.float32)
        * std_out
    )
    return w_in, w_out


# ---------------------------------------------------------------------------
# Reference (pure JAX) for sanity check
# ---------------------------------------------------------------------------
def _apply_rotary_ref(x):
    B, S, H, D = x.shape
    cos, sin = rotary_tables(S, D)
    cos = cos[None, :, None, :]
    sin = sin[None, :, None, :]
    x1, x2 = jnp.split(x, 2, axis=-1)
    rot = jnp.concatenate([-x2, x1], axis=-1)
    return x * cos + rot * sin


def reference_forward(x, w_in, w_out, n_heads):
    B, S, dim = x.shape
    head_dim = dim // n_heads
    qkv = x @ w_in.T
    q, k, v = jnp.split(qkv, 3, axis=-1)
    q = _apply_rotary_ref(q.reshape(B, S, n_heads, head_dim))
    k = _apply_rotary_ref(k.reshape(B, S, n_heads, head_dim))
    v = v.reshape(B, S, n_heads, head_dim)
    q = q.transpose(0, 2, 1, 3)
    k = k.transpose(0, 2, 1, 3)
    v = v.transpose(0, 2, 1, 3)
    s = jnp.einsum("bhqd,bhkd->bhqk", q, k) * (head_dim ** -0.5)
    p = jax.nn.softmax(s, axis=-1)
    o = jnp.einsum("bhqk,bhkd->bhqd", p, v)
    o = o.transpose(0, 2, 1, 3).reshape(B, S, dim)
    return o @ w_out.T


# ---------------------------------------------------------------------------
# Main
# ---------------------------------------------------------------------------
if __name__ == "__main__":
    # Small, module-consistent shapes: dim = n_heads * head_dim
    B, S = 2, 16
    n_heads, head_dim = 4, 32
    dim = n_heads * head_dim  # 128
    layer_id = 0

    key = jax.random.PRNGKey(0)
    k_x, k_w = jax.random.split(key)
    x = jax.random.normal(k_x, (B, S, dim), dtype=jnp.float32)
    w_in, w_out = init_params(k_w, dim, n_heads, layer_id)

    out, past_kv = custom_openlm_attn_forward(x, w_in, w_out, n_heads)
    out = jax.block_until_ready(out)

    ref = reference_forward(x, w_in, w_out, n_heads)
    assert out.shape == (B, S, dim)
    assert past_kv is None
    # approx reciprocal in the softmax denominator -> slightly looser tolerance
    assert jnp.allclose(out, ref, atol=2e-3, rtol=2e-3), "mismatch vs reference"

    print("KERNEL_OK")
</pallas_src>

<mosaic_0001>
module attributes {stable_mosaic.version = 11 : i64} {
  func.func @_fused_attn_kernel(%arg0: i32, %arg1: memref<1x16x128xf32, #tpu.memory_space<vmem>>, %arg2: memref<384x128xf32, #tpu.memory_space<vmem>>, %arg3: memref<128x128xf32, #tpu.memory_space<vmem>>, %arg4: memref<16x32xf32, #tpu.memory_space<vmem>>, %arg5: memref<16x32xf32, #tpu.memory_space<vmem>>, %arg6: memref<1x16x128xf32, #tpu.memory_space<vmem>>) attributes {dimension_semantics = [#tpu.dimension_semantics<parallel>], iteration_bounds = array<i64: 2>, scalar_prefetch = 0 : i64, scratch_operands = 0 : i64, tpu.core_type = #tpu.core_type<tc>, window_params = [{transform_indices = @transform_0, window_bounds = array<i64: 1, 16, 128>}, {pipeline_mode = #tpu.pipeline_mode<synchronous>, transform_indices = @transform_1, window_bounds = array<i64: 384, 128>}, {pipeline_mode = #tpu.pipeline_mode<synchronous>, transform_indices = @transform_2, window_bounds = array<i64: 128, 128>}, {pipeline_mode = #tpu.pipeline_mode<synchronous>, transform_indices = @transform_3, window_bounds = array<i64: 16, 32>}, {pipeline_mode = #tpu.pipeline_mode<synchronous>, transform_indices = @transform_4, window_bounds = array<i64: 16, 32>}, {transform_indices = @transform_5, window_bounds = array<i64: 1, 16, 128>}]} {
    %c0 = arith.constant 0 : index
    %c0_0 = arith.constant 0 : index
    %c0_1 = arith.constant 0 : index
    %0 = vector.load %arg1[%c0, %c0_0, %c0_1] : memref<1x16x128xf32, #tpu.memory_space<vmem>>, vector<1x16x128xf32>
    %1 = vector.shape_cast %0 : vector<1x16x128xf32> to vector<16x128xf32>
    %c0_2 = arith.constant 0 : index
    %c0_3 = arith.constant 0 : index
    %2 = vector.load %arg2[%c0_2, %c0_3] : memref<384x128xf32, #tpu.memory_space<vmem>>, vector<384x128xf32>
    %c0_4 = arith.constant 0 : index
    %c0_5 = arith.constant 0 : index
    %3 = vector.load %arg3[%c0_4, %c0_5] : memref<128x128xf32, #tpu.memory_space<vmem>>, vector<128x128xf32>
    %c0_6 = arith.constant 0 : index
    %c0_7 = arith.constant 0 : index
    %4 = vector.load %arg4[%c0_6, %c0_7] : memref<16x32xf32, #tpu.memory_space<vmem>>, vector<16x32xf32>
    %c0_8 = arith.constant 0 : index
    %c0_9 = arith.constant 0 : index
    %5 = vector.load %arg5[%c0_8, %c0_9] : memref<16x32xf32, #tpu.memory_space<vmem>>, vector<16x32xf32>
    %cst = arith.constant dense<0.000000e+00> : vector<16x384xf32>
    %6 = tpu.matmul %1, %2, %cst {dimension_numbers = #tpu.dot_dimension_numbers<[1], [1], [0], [0], [0, 0, 1, 0], [], []>} : vector<16x128xf32>, vector<384x128xf32>, vector<16x384xf32> -> vector<16x384xf32>
    %7 = vector.extract_strided_slice %6 {offsets = [0, 0], sizes = [16, 32], strides = [1, 1]} : vector<16x384xf32> to vector<16x32xf32>
    %8 = vector.extract_strided_slice %6 {offsets = [0, 128], sizes = [16, 32], strides = [1, 1]} : vector<16x384xf32> to vector<16x32xf32>
    %9 = vector.extract_strided_slice %6 {offsets = [0, 256], sizes = [16, 32], strides = [1, 1]} : vector<16x384xf32> to vector<16x32xf32>
    %10 = arith.mulf %7, %4 : vector<16x32xf32>
    %11 = vector.extract_strided_slice %7 {offsets = [0, 0], sizes = [16, 16], strides = [1, 1]} : vector<16x32xf32> to vector<16x16xf32>
    %12 = vector.extract_strided_slice %7 {offsets = [0, 16], sizes = [16, 16], strides = [1, 1]} : vector<16x32xf32> to vector<16x16xf32>
    %cst_10 = arith.constant 0.000000e+00 : f32
    %13 = vector.broadcast %cst_10 : f32 to vector<16x16xf32>
    %14 = arith.subf %13, %12 : vector<16x16xf32>
    %15 = tpu.concatenate %14, %11 in 1 : vector<16x16xf32>, vector<16x16xf32> -> vector<16x32xf32>
    %16 = arith.mulf %15, %5 : vector<16x32xf32>
    %17 = arith.addf %10, %16 : vector<16x32xf32>
    %18 = arith.mulf %8, %4 : vector<16x32xf32>
    %19 = vector.extract_strided_slice %8 {offsets = [0, 0], sizes = [16, 16], strides = [1, 1]} : vector<16x32xf32> to vector<16x16xf32>
    %20 = vector.extract_strided_slice %8 {offsets = [0, 16], sizes = [16, 16], strides = [1, 1]} : vector<16x32xf32> to vector<16x16xf32>
    %cst_11 = arith.constant 0.000000e+00 : f32
    %21 = vector.broadcast %cst_11 : f32 to vector<16x16xf32>
    %22 = arith.subf %21, %20 : vector<16x16xf32>
    %23 = tpu.concatenate %22, %19 in 1 : vector<16x16xf32>, vector<16x16xf32> -> vector<16x32xf32>
    %24 = arith.mulf %23, %5 : vector<16x32xf32>
    %25 = arith.addf %18, %24 : vector<16x32xf32>
    %cst_12 = arith.constant dense<0.000000e+00> : vector<16x16xf32>
    %26 = tpu.matmul %17, %25, %cst_12 {dimension_numbers = #tpu.dot_dimension_numbers<[1], [1], [0], [0], [0, 0, 1, 0], [], []>} : vector<16x32xf32>, vector<16x32xf32>, vector<16x16xf32> -> vector<16x16xf32>
    %cst_13 = arith.constant 0.176776692 : f32
    %27 = vector.broadcast %cst_13 : f32 to vector<16x16xf32>
    %28 = arith.mulf %26, %27 : vector<16x16xf32>
    %cst_14 = arith.constant dense<0xFF800000> : vector<16xf32>
    %29 = vector.multi_reduction <maximumf>, %28, %cst_14 [1] : vector<16x16xf32> to vector<16xf32>
    %30 = vector.shape_cast %29 : vector<16xf32> to vector<16x1xf32>
    %31 = vector.broadcast %30 : vector<16x1xf32> to vector<16x16xf32>
    %32 = arith.subf %28, %31 : vector<16x16xf32>
    %33 = math.exp %32 : vector<16x16xf32>
    %cst_15 = arith.constant dense<0.000000e+00> : vector<16xf32>
    %34 = vector.multi_reduction <add>, %33, %cst_15 [1] : vector<16x16xf32> to vector<16xf32>
    %35 = vector.shape_cast %34 : vector<16xf32> to vector<16x1xf32>
    %36 = tpu.reciprocal %35 {approx = true} : vector<16x1xf32> -> vector<16x1xf32>
    %cst_16 = arith.constant dense<0.000000e+00> : vector<16x32xf32>
    %37 = tpu.matmul %33, %9, %cst_16 {dimension_numbers = #tpu.dot_dimension_numbers<[1], [0], [0], [1], [0, 0, 1, 1], [], []>} : vector<16x16xf32>, vector<16x32xf32>, vector<16x32xf32> -> vector<16x32xf32>
    %38 = vector.broadcast %36 : vector<16x1xf32> to vector<16x32xf32>
    %39 = arith.mulf %37, %38 : vector<16x32xf32>
    %40 = vector.extract_strided_slice %6 {offsets = [0, 32], sizes = [16, 32], strides = [1, 1]} : vector<16x384xf32> to vector<16x32xf32>
    %41 = vector.extract_strided_slice %6 {offsets = [0, 160], sizes = [16, 32], strides = [1, 1]} : vector<16x384xf32> to vector<16x32xf32>
    %42 = vector.extract_strided_slice %6 {offsets = [0, 288], sizes = [16, 32], strides = [1, 1]} : vector<16x384xf32> to vector<16x32xf32>
    %43 = arith.mulf %40, %4 : vector<16x32xf32>
    %44 = vector.extract_strided_slice %40 {offsets = [0, 0], sizes = [16, 16], strides = [1, 1]} : vector<16x32xf32> to vector<16x16xf32>
    %45 = vector.extract_strided_slice %40 {offsets = [0, 16], sizes = [16, 16], strides = [1, 1]} : vector<16x32xf32> to vector<16x16xf32>
    %cst_17 = arith.constant 0.000000e+00 : f32
    %46 = vector.broadcast %cst_17 : f32 to vector<16x16xf32>
    %47 = arith.subf %46, %45 : vector<16x16xf32>
    %48 = tpu.concatenate %47, %44 in 1 : vector<16x16xf32>, vector<16x16xf32> -> vector<16x32xf32>
    %49 = arith.mulf %48, %5 : vector<16x32xf32>
    %50 = arith.addf %43, %49 : vector<16x32xf32>
    %51 = arith.mulf %41, %4 : vector<16x32xf32>
    %52 = vector.extract_strided_slice %41 {offsets = [0, 0], sizes = [16, 16], strides = [1, 1]} : vector<16x32xf32> to vector<16x16xf32>
    %53 = vector.extract_strided_slice %41 {offsets = [0, 16], sizes = [16, 16], strides = [1, 1]} : vector<16x32xf32> to vector<16x16xf32>
    %cst_18 = arith.constant 0.000000e+00 : f32
    %54 = vector.broadcast %cst_18 : f32 to vector<16x16xf32>
    %55 = arith.subf %54, %53 : vector<16x16xf32>
    %56 = tpu.concatenate %55, %52 in 1 : vector<16x16xf32>, vector<16x16xf32> -> vector<16x32xf32>
    %57 = arith.mulf %56, %5 : vector<16x32xf32>
    %58 = arith.addf %51, %57 : vector<16x32xf32>
    %cst_19 = arith.constant dense<0.000000e+00> : vector<16x16xf32>
    %59 = tpu.matmul %50, %58, %cst_19 {dimension_numbers = #tpu.dot_dimension_numbers<[1], [1], [0], [0], [0, 0, 1, 0], [], []>} : vector<16x32xf32>, vector<16x32xf32>, vector<16x16xf32> -> vector<16x16xf32>
    %cst_20 = arith.constant 0.176776692 : f32
    %60 = vector.broadcast %cst_20 : f32 to vector<16x16xf32>
    %61 = arith.mulf %59, %60 : vector<16x16xf32>
    %cst_21 = arith.constant dense<0xFF800000> : vector<16xf32>
    %62 = vector.multi_reduction <maximumf>, %61, %cst_21 [1] : vector<16x16xf32> to vector<16xf32>
    %63 = vector.shape_cast %62 : vector<16xf32> to vector<16x1xf32>
    %64 = vector.broadcast %63 : vector<16x1xf32> to vector<16x16xf32>
    %65 = arith.subf %61, %64 : vector<16x16xf32>
    %66 = math.exp %65 : vector<16x16xf32>
    %cst_22 = arith.constant dense<0.000000e+00> : vector<16xf32>
    %67 = vector.multi_reduction <add>, %66, %cst_22 [1] : vector<16x16xf32> to vector<16xf32>
    %68 = vector.shape_cast %67 : vector<16xf32> to vector<16x1xf32>
    %69 = tpu.reciprocal %68 {approx = true} : vector<16x1xf32> -> vector<16x1xf32>
    %cst_23 = arith.constant dense<0.000000e+00> : vector<16x32xf32>
    %70 = tpu.matmul %66, %42, %cst_23 {dimension_numbers = #tpu.dot_dimension_numbers<[1], [0], [0], [1], [0, 0, 1, 1], [], []>} : vector<16x16xf32>, vector<16x32xf32>, vector<16x32xf32> -> vector<16x32xf32>
    %71 = vector.broadcast %69 : vector<16x1xf32> to vector<16x32xf32>
    %72 = arith.mulf %70, %71 : vector<16x32xf32>
    %73 = vector.extract_strided_slice %6 {offsets = [0, 64], sizes = [16, 32], strides = [1, 1]} : vector<16x384xf32> to vector<16x32xf32>
    %74 = vector.extract_strided_slice %6 {offsets = [0, 192], sizes = [16, 32], strides = [1, 1]} : vector<16x384xf32> to vector<16x32xf32>
    %75 = vector.extract_strided_slice %6 {offsets = [0, 320], sizes = [16, 32], strides = [1, 1]} : vector<16x384xf32> to vector<16x32xf32>
    %76 = arith.mulf %73, %4 : vector<16x32xf32>
    %77 = vector.extract_strided_slice %73 {offsets = [0, 0], sizes = [16, 16], strides = [1, 1]} : vector<16x32xf32> to vector<16x16xf32>
    %78 = vector.extract_strided_slice %73 {offsets = [0, 16], sizes = [16, 16], strides = [1, 1]} : vector<16x32xf32> to vector<16x16xf32>
    %cst_24 = arith.constant 0.000000e+00 : f32
    %79 = vector.broadcast %cst_24 : f32 to vector<16x16xf32>
    %80 = arith.subf %79, %78 : vector<16x16xf32>
    %81 = tpu.concatenate %80, %77 in 1 : vector<16x16xf32>, vector<16x16xf32> -> vector<16x32xf32>
    %82 = arith.mulf %81, %5 : vector<16x32xf32>
    %83 = arith.addf %76, %82 : vector<16x32xf32>
    %84 = arith.mulf %74, %4 : vector<16x32xf32>
    %85 = vector.extract_strided_slice %74 {offsets = [0, 0], sizes = [16, 16], strides = [1, 1]} : vector<16x32xf32> to vector<16x16xf32>
    %86 = vector.extract_strided_slice %74 {offsets = [0, 16], sizes = [16, 16], strides = [1, 1]} : vector<16x32xf32> to vector<16x16xf32>
    %cst_25 = arith.constant 0.000000e+00 : f32
    %87 = vector.broadcast %cst_25 : f32 to vector<16x16xf32>
    %88 = arith.subf %87, %86 : vector<16x16xf32>
    %89 = tpu.concatenate %88, %85 in 1 : vector<16x16xf32>, vector<16x16xf32> -> vector<16x32xf32>
    %90 = arith.mulf %89, %5 : vector<16x32xf32>
    %91 = arith.addf %84, %90 : vector<16x32xf32>
    %cst_26 = arith.constant dense<0.000000e+00> : vector<16x16xf32>
    %92 = tpu.matmul %83, %91, %cst_26 {dimension_numbers = #tpu.dot_dimension_numbers<[1], [1], [0], [0], [0, 0, 1, 0], [], []>} : vector<16x32xf32>, vector<16x32xf32>, vector<16x16xf32> -> vector<16x16xf32>
    %cst_27 = arith.constant 0.176776692 : f32
    %93 = vector.broadcast %cst_27 : f32 to vector<16x16xf32>
    %94 = arith.mulf %92, %93 : vector<16x16xf32>
    %cst_28 = arith.constant dense<0xFF800000> : vector<16xf32>
    %95 = vector.multi_reduction <maximumf>, %94, %cst_28 [1] : vector<16x16xf32> to vector<16xf32>
    %96 = vector.shape_cast %95 : vector<16xf32> to vector<16x1xf32>
    %97 = vector.broadcast %96 : vector<16x1xf32> to vector<16x16xf32>
    %98 = arith.subf %94, %97 : vector<16x16xf32>
    %99 = math.exp %98 : vector<16x16xf32>
    %cst_29 = arith.constant dense<0.000000e+00> : vector<16xf32>
    %100 = vector.multi_reduction <add>, %99, %cst_29 [1] : vector<16x16xf32> to vector<16xf32>
    %101 = vector.shape_cast %100 : vector<16xf32> to vector<16x1xf32>
    %102 = tpu.reciprocal %101 {approx = true} : vector<16x1xf32> -> vector<16x1xf32>
    %cst_30 = arith.constant dense<0.000000e+00> : vector<16x32xf32>
    %103 = tpu.matmul %99, %75, %cst_30 {dimension_numbers = #tpu.dot_dimension_numbers<[1], [0], [0], [1], [0, 0, 1, 1], [], []>} : vector<16x16xf32>, vector<16x32xf32>, vector<16x32xf32> -> vector<16x32xf32>
    %104 = vector.broadcast %102 : vector<16x1xf32> to vector<16x32xf32>
    %105 = arith.mulf %103, %104 : vector<16x32xf32>
    %106 = vector.extract_strided_slice %6 {offsets = [0, 96], sizes = [16, 32], strides = [1, 1]} : vector<16x384xf32> to vector<16x32xf32>
    %107 = vector.extract_strided_slice %6 {offsets = [0, 224], sizes = [16, 32], strides = [1, 1]} : vector<16x384xf32> to vector<16x32xf32>
    %108 = vector.extract_strided_slice %6 {offsets = [0, 352], sizes = [16, 32], strides = [1, 1]} : vector<16x384xf32> to vector<16x32xf32>
    %109 = arith.mulf %106, %4 : vector<16x32xf32>
    %110 = vector.extract_strided_slice %106 {offsets = [0, 0], sizes = [16, 16], strides = [1, 1]} : vector<16x32xf32> to vector<16x16xf32>
    %111 = vector.extract_strided_slice %106 {offsets = [0, 16], sizes = [16, 16], strides = [1, 1]} : vector<16x32xf32> to vector<16x16xf32>
    %cst_31 = arith.constant 0.000000e+00 : f32
    %112 = vector.broadcast %cst_31 : f32 to vector<16x16xf32>
    %113 = arith.subf %112, %111 : vector<16x16xf32>
    %114 = tpu.concatenate %113, %110 in 1 : vector<16x16xf32>, vector<16x16xf32> -> vector<16x32xf32>
    %115 = arith.mulf %114, %5 : vector<16x32xf32>
    %116 = arith.addf %109, %115 : vector<16x32xf32>
    %117 = arith.mulf %107, %4 : vector<16x32xf32>
    %118 = vector.extract_strided_slice %107 {offsets = [0, 0], sizes = [16, 16], strides = [1, 1]} : vector<16x32xf32> to vector<16x16xf32>
    %119 = vector.extract_strided_slice %107 {offsets = [0, 16], sizes = [16, 16], strides = [1, 1]} : vector<16x32xf32> to vector<16x16xf32>
    %cst_32 = arith.constant 0.000000e+00 : f32
    %120 = vector.broadcast %cst_32 : f32 to vector<16x16xf32>
    %121 = arith.subf %120, %119 : vector<16x16xf32>
    %122 = tpu.concatenate %121, %118 in 1 : vector<16x16xf32>, vector<16x16xf32> -> vector<16x32xf32>
    %123 = arith.mulf %122, %5 : vector<16x32xf32>
    %124 = arith.addf %117, %123 : vector<16x32xf32>
    %cst_33 = arith.constant dense<0.000000e+00> : vector<16x16xf32>
    %125 = tpu.matmul %116, %124, %cst_33 {dimension_numbers = #tpu.dot_dimension_numbers<[1], [1], [0], [0], [0, 0, 1, 0], [], []>} : vector<16x32xf32>, vector<16x32xf32>, vector<16x16xf32> -> vector<16x16xf32>
    %cst_34 = arith.constant 0.176776692 : f32
    %126 = vector.broadcast %cst_34 : f32 to vector<16x16xf32>
    %127 = arith.mulf %125, %126 : vector<16x16xf32>
    %cst_35 = arith.constant dense<0xFF800000> : vector<16xf32>
    %128 = vector.multi_reduction <maximumf>, %127, %cst_35 [1] : vector<16x16xf32> to vector<16xf32>
    %129 = vector.shape_cast %128 : vector<16xf32> to vector<16x1xf32>
    %130 = vector.broadcast %129 : vector<16x1xf32> to vector<16x16xf32>
    %131 = arith.subf %127, %130 : vector<16x16xf32>
    %132 = math.exp %131 : vector<16x16xf32>
    %cst_36 = arith.constant dense<0.000000e+00> : vector<16xf32>
    %133 = vector.multi_reduction <add>, %132, %cst_36 [1] : vector<16x16xf32> to vector<16xf32>
    %134 = vector.shape_cast %133 : vector<16xf32> to vector<16x1xf32>
    %135 = tpu.reciprocal %134 {approx = true} : vector<16x1xf32> -> vector<16x1xf32>
    %cst_37 = arith.constant dense<0.000000e+00> : vector<16x32xf32>
    %136 = tpu.matmul %132, %108, %cst_37 {dimension_numbers = #tpu.dot_dimension_numbers<[1], [0], [0], [1], [0, 0, 1, 1], [], []>} : vector<16x16xf32>, vector<16x32xf32>, vector<16x32xf32> -> vector<16x32xf32>
    %137 = vector.broadcast %135 : vector<16x1xf32> to vector<16x32xf32>
    %138 = arith.mulf %136, %137 : vector<16x32xf32>
    %139 = tpu.concatenate %39, %72, %105, %138 in 1 : vector<16x32xf32>, vector<16x32xf32>, vector<16x32xf32>, vector<16x32xf32> -> vector<16x128xf32>
    %cst_38 = arith.constant dense<0.000000e+00> : vector<16x128xf32>
    %140 = tpu.matmul %139, %3, %cst_38 {dimension_numbers = #tpu.dot_dimension_numbers<[1], [1], [0], [0], [0, 0, 1, 0], [], []>} : vector<16x128xf32>, vector<128x128xf32>, vector<16x128xf32> -> vector<16x128xf32>
    %c0_39 = arith.constant 0 : index
    %c0_40 = arith.constant 0 : index
    %c0_41 = arith.constant 0 : index
    %141 = vector.load %arg6[%c0_39, %c0_40, %c0_41] : memref<1x16x128xf32, #tpu.memory_space<vmem>>, vector<1x16x128xf32>
    %142 = vector.shape_cast %141 : vector<1x16x128xf32> to vector<16x128xf32>
    %143 = vector.shape_cast %140 : vector<16x128xf32> to vector<1x16x128xf32>
    tpu.vector_store %arg6[%c0_39, %c0_40, %c0_41], %143 {strides = array<i32>} : memref<1x16x128xf32, #tpu.memory_space<vmem>>, vector<1x16x128xf32>,
    return
  }
  func.func @transform_0(%arg0: i32) -> (i32, i32, i32) {
    %c0_i32 = arith.constant 0 : i32
    %c0_i32_0 = arith.constant 0 : i32
    %c0_i32_1 = arith.constant 0 : i32
    return %arg0, %c0_i32, %c0_i32_0 : i32, i32, i32
  }
  func.func @transform_1(%arg0: i32) -> (i32, i32) {
    %c0_i32 = arith.constant 0 : i32
    %c0_i32_0 = arith.constant 0 : i32
    %c0_i32_1 = arith.constant 0 : i32
    return %c0_i32, %c0_i32_0 : i32, i32
  }
  func.func @transform_2(%arg0: i32) -> (i32, i32) {
    %c0_i32 = arith.constant 0 : i32
    %c0_i32_0 = arith.constant 0 : i32
    %c0_i32_1 = arith.constant 0 : i32
    return %c0_i32, %c0_i32_0 : i32, i32
  }
  func.func @transform_3(%arg0: i32) -> (i32, i32) {
    %c0_i32 = arith.constant 0 : i32
    %c0_i32_0 = arith.constant 0 : i32
    %c0_i32_1 = arith.constant 0 : i32
    return %c0_i32, %c0_i32_0 : i32, i32
  }
  func.func @transform_4(%arg0: i32) -> (i32, i32) {
    %c0_i32 = arith.constant 0 : i32
    %c0_i32_0 = arith.constant 0 : i32
    %c0_i32_1 = arith.constant 0 : i32
    return %c0_i32, %c0_i32_0 : i32, i32
  }
  func.func @transform_5(%arg0: i32) -> (i32, i32, i32) {
    %c0_i32 = arith.constant 0 : i32
    %c0_i32_0 = arith.constant 0 : i32
    %c0_i32_1 = arith.constant 0 : i32
    return %arg0, %c0_i32, %c0_i32_0 : i32, i32, i32
  }
}

</mosaic_0001>

<bundles_post_ra>
// kernel: tpu_custom_call.1
= control target key start
LH: loop header
LB: loop body
LE: loop exit
PB: predicated region body
PF: predicated region fallthrough
CT: control target
= control target key end

     0   :  { %10 = vsyncpa [#allocation3], 0  ;;  %s2183_s0 = inlined_call_operand.hbm [shape: f32[2,16,128], index: 0, kind: input, shape index: {}]   ;;  %s2184_s1 = inlined_call_operand.hbm [shape: f32[384,128], index: 1, kind: input, shape index: {}]   ;;  %s2185_s2 = inlined_call_operand.hbm [shape: f32[128,128], index: 2, kind: input, shape index: {}]   ;;  %s2186_s3 = inlined_call_operand.hbm [shape: f32[16,32], index: 3, kind: input, shape index: {}]   ;;  %s2187_s4 = inlined_call_operand.hbm [shape: f32[16,32], index: 4, kind: input, shape index: {}]   ;;  %s2188_s5 = inlined_call_operand.hbm [shape: f32[2,16,128], index: 5, kind: output, shape index: {}]  }
   0x1   :  { %12 = vsyncpa [#allocation3 + $0x1], 0 }
   0x2   :  { %13 = vsyncpa [#allocation6], 0 }
   0x3   :  { %14 = vsyncpa [#allocation9], 0 }
   0x4   :  { %15 = vsyncpa [#allocation4], 0 }
   0x5   :  { %17 = vsyncpa [#allocation4 + $0x1], 0  ;;  %s1738_s18 = smov 0   ;;  %s1740_s19 = smov 0  }
   0x6   :  { %s1742_s20 = smov 0   ;;  %s1744_s21 = smov 0  }
   0x7 LB: > { %s1759_s22 = sadd.s32 4294967295, %s1691_s21   ;;  %s1272_s23 = sadd.s32 4294967294, %s1691_s21   ;;  %s1691_s21 = sphi %s1744_s21, %s2201_s21   ;;  %s1687_s20 = sphi %s1742_s20, %s2200_s20   ;;  %s1683_s19 = sphi %s1740_s19, %s2199_s19   ;;  %s1679_s18 = sphi %s1738_s18, %s2198_s18  }
   0x8   : > { %p43_p0 = scmp.ne.s32.totalorder %s1683_s19, %s1679_s18  ;;  %p44_p1 = scmp.eq.s32.totalorder %s1759_s22, 0 }
   0x9   : > { %p151_p2 = scmp.eq.s32.totalorder %s1759_s22, 1  ;;  %p157_p3 = scmp.eq.s32.totalorder %s1272_s23, 1 }
   0xa   : > { %p1768_p4 = por %p44_p1, %p43_p0  ;;  %p1273_p5 = scmp.ge.s32.totalorder %s1691_s21, 1 }
   0xb   : > { %p1773_p6 = por %p157_p3, %p43_p0  ;;  %p164_p7 = scmp.lt.s32.totalorder %s1691_s21, 3 }
   0xc   : > { %s175_s28 = sshll.u32 %s2184_s1, 4  ;;  %s1693_s30 = smov [#allocation5]   ;;  %s176_s28 = int_to_ptr.hbm [resolvable:$true] %s175_s28 }
   0xd   : > { %p1781_p8 = pnand %p1273_p5, %p164_p7  ;;  %s177_s6 = sshll.u32 %s1693_s30, 4  ;;  %s178_s6 = int_to_ptr.vmem [resolvable:$true] %s177_s6 }
   0xe   : > { %s203_s10 = sshll.u32 %s2186_s3, 4  ;;  %s2189_s11 = smov 128   ;;  %s204_s10 = int_to_ptr.hbm [resolvable:$true] %s203_s10 }
   0xf   : > { %p1342_p9 = pneg %p1781_p8  ;;  %s1695_s12 = smov 8  }
  0x10   : > { %s1696_s13 = smov [#allocation8]   ;;  %s189_s17 = sshll.u32 %s2185_s2, 4  ;;  %s190_s17 = int_to_ptr.hbm [resolvable:$true] %s189_s17 }
  0x11   : > { %p1789_p10 = pnand %p1342_p9, %p44_p1  ;;  %s205_s14 = sshll.u32 %s1696_s13, 4  ;;  %s206_s14 = int_to_ptr.vmem [resolvable:$true] %s205_s14 }
  0x12   : > { %s217_s27 = sshll.u32 %s2187_s4, 4  ;;  %s1824_s9 = sadd.s32 1, %s1691_s21   ;;  %s218_s27 = int_to_ptr.hbm [resolvable:$true] %s217_s27 }
  0x13   : > { %1345 = dma.hbm_to_vmem [thread:$0]  (!%p1789_p10), %s176_s28, 6144, %s178_s6, [#allocation6], %s2189_s11, %s2189_s11, %s1695_s12  }
  0x14   : > { %1351 = dma.hbm_to_vmem [thread:$0]  (!%p1789_p10), %s204_s10, 256, %s206_s14, [#allocation9], %s2189_s11, %s2189_s11, %s1695_s12  }
  0x15   : > { %s1697_s28 = smov [#allocation7]   ;;  %s1698_s6 = smov [#allocation10]  }
  0x16   : > { %s191_s30 = sshll.u32 %s1697_s28, 4  ;;  %s219_s8 = sshll.u32 %s1698_s6, 4  ;;  %s192_s30 = int_to_ptr.vmem [resolvable:$true] %s191_s30  ;;  %s220_s8 = int_to_ptr.vmem [resolvable:$true] %s219_s8 }
  0x17   : > { %1348 = dma.hbm_to_vmem [thread:$0]  (!%p1789_p10), %s190_s17, 2048, %s192_s30, [#allocation6], %s2189_s11, %s2189_s11, %s1695_s12  }
  0x18   : > { %1354 = dma.hbm_to_vmem [thread:$0]  (!%p1789_p10), %s218_s27, 256, %s220_s8, [#allocation9], %s2189_s11, %s2189_s11, %s1695_s12  }
  0x19   : > { %s30_s10 = sadd.s32 1, %s1687_s20  ;;  %s27_s13 = ssub.s32 %s1691_s21, %s1824_s9 }
  0x1a   : > { %p37_p12 = scmp.ne.s32.totalorder %s1687_s20, %s1683_s19  ;;  %p28_p13 = scmp.eq.s32.totalorder %s27_s13, 0 }
  0x1b   : > { %p38_p0 = scmp.eq.s32.totalorder %s1691_s21, 0  ;;  %p1367_p5 = scmp.lt.s32.totalorder %s1691_s21, 2 }
  0x1c   : > { %p1834_p3 = por %p151_p2, %p37_p12  ;;  %s233_s7 = sand.u32 1, %s1687_s20  }
  0x1d   : > { %s1840_s15 = scalar_select %p28_p13, %s1687_s20, %s30_s10  }
  0x1e   : > { %p39_p7 = por %p38_p0, %p37_p12  ;;  %s1279_s16 = sshll.u32 %s233_s7, 4 }
  0x1f   : > { %s1318_s17 = sshll.u32 %s1691_s21, 4  ;;  %s237_s28 = scalar_lea.vmem [#allocation2], %s1279_s16 }
  0x20   : > { %s242_s27 = scalar_lea.hbm %s2183_s0, %s1318_s17  ;;  %s245_s30 = sshll.u32 %s237_s28, 4  ;;  %s246_s30 = int_to_ptr.vmem [resolvable:$true] %s245_s30 }
  0x21   : > { %s243_s6 = sshll.u32 %s242_s27, 4  ;;  %p1847_p2 = pnand %p1367_p5, %p39_p7  ;;  %s244_s6 = int_to_ptr.hbm [resolvable:$true] %s243_s6 }
  0x22   : > { %s234_s10 = scalar_lea.sflag [#allocation3], %s233_s7  ;;  %s1587_s13 = sshra.s32 %s244_s6, 4  ;;  %s1588_s13 = int_to_ptr.hbm [resolvable:$true] %s1587_s13 }
  0x23   : > { %s1589_s11 = scalar_lea.hbm %s1588_s13, 16  ;;  %p1591_p10 = pneg %p1847_p2 }
  0x24   : > { %p1590_p9 = scmp.ne.s32.totalorder %s1588_s13, %s1589_s11  ;;  %s1594_s23 = scalar_lea.hbm %s2183_s0, 32 }
  0x25   : > { %p1595_p0 = scmp.lt.s32.totalorder %s1588_s13, %s2183_s0  ;;  %p1596_p5 = scmp.lt.s32.totalorder %s1594_s23, %s1589_s11 }
  0x26   : > { %p1592_p12 = pnand %p1591_p10, %p1590_p9 }
  0x27   : > { %p1597_p7 = por %p1596_p5, %p1595_p0 }
  0x28   : > { %p1593_p13 = pneg %p1592_p12 }
  0x2a   : > { %p1598_p11 = pnand %p1597_p7, %p1593_p13 }
  0x2c   : > { %1601 = shalt.err (!%p1598_p11)
}
  0x2d   : > { %s2196_s7 = smov 128   ;;  %257 = sbr.rel (%p1781_p8) target bundleno = 1616 (0x650), region = 40 }
  0x2e   : > { %1358 = dma.hbm_to_vmem [thread:$0]  (!%p1847_p2), %s244_s6, 256, %s246_s30, %s234_s10, %s2196_s7, %s2196_s7, %s1695_s12  }
  0x2f   : > { %s1867_s28 = sand.u32 (!%p1781_p8), 1, %s1683_s19  }
  0x30   : > { %s1283_s11 = sshll.u32 (!%p1781_p8), %s1867_s28, 4  ;;  %s260_s13 = scalar_lea.sflag (!%p1781_p8), [#allocation3], %s1867_s28 }
  0x31   : > { %s1873_s17 = scalar_lea.vmem (!%p1781_p8), [#allocation2], %s1283_s11 }
  0x32   : > { %1662 = dma.done.wait (%p1768_p4), %s260_s13, 256  }
  0x33   : > { %1664 = vsyncadd (%p1768_p4), %s260_s13, 4294967040 }
  0x34   : > { %1666 = dma.done.wait (%p44_p1), [#allocation6], 8192  }
  0x35   : > { %1668 = vsyncadd (%p44_p1), [#allocation6], 4294959104 }
  0x36   : > { %1670 = dma.done.wait (%p44_p1), [#allocation9], 512  }
  0x37   : > { %1672 = vsyncadd (%p44_p1), [#allocation9], 4294966784  ;;  %v328_v0 = vld [vmem:[#allocation5 + $0x78] sm:$0xff]  ;;  %v327_v2 = vld [vmem:[#allocation5 + $0x70] sm:$0xff]  ;;  %s1699_s24 = smov 80   ;;  %s1700_s29 = smov 112  }
  0x38   : > { %v344_v1 = vld [vmem:[#allocation5 + $0xf8] sm:$0xff]  ;;  %381 = vmatpush.xpose.msra.mxu0 %v328_v0  ;;  %v343_v3 = vld [vmem:[#allocation5 + $0xf0] sm:$0xff]  ;;  %v326_v4 = vld [vmem:[#allocation5 + $0x68] sm:$0xff]  ;;  %s1701_s12 = smov 32   ;;  %vm470_vm0 = vcmask 130048   ;;  %s1702_s30 = smov 16  }
  0x39   : > { %404 = vmatpush.xpose.msra.mxu1 %v344_v1  ;;  %v342_v5 = vld [vmem:[#allocation5 + $0xe8] sm:$0xff]  ;;  %v325_v6 = vld [vmem:[#allocation5 + $0x60] sm:$0xff]  ;;  %v324_v8 = vld [vmem:[#allocation5 + $0x58] sm:$0xff]  ;;  %s1703_s6 = smov 96   ;;  %s1704_s8 = smov 48   ;;  %vm503_vm1 = vcmask 261120  }
  0x3a   : > { %v341_v7 = vld [vmem:[#allocation5 + $0xe0] sm:$0xff]  ;;  %v340_v9 = vld [vmem:[#allocation5 + $0xd8] sm:$0xff]  ;;  %v323_v10 = vld [vmem:[#allocation5 + $0x50] sm:$0xff]  ;;  %s1705_s10 = smov 64   ;;  %vm1114_vm2 = vcmask 523264   ;;  %vm1117_vm3 = vcmask 785408  }
  0x3b   : > { %v339_v11 = vld [vmem:[#allocation5 + $0xd0] sm:$0xff]  ;;  %v322_v12 = vld [vmem:[#allocation5 + $0x48] sm:$0xff]  ;;  %v321_v14 = vld [vmem:[#allocation5 + $0x40] sm:$0xff]  ;;  %s310_s16 = scalar_lea.vmem [#allocation11], %s1283_s11  ;;  %s1319_s23 = sshll.u32 %s1759_s22, 4 }
  0x3c   : > { %382 = vmatpush.xpose.msra.mxu0 %v327_v2  ;;  %v338_v13 = vld [vmem:[#allocation5 + $0xc8] sm:$0xff]  ;;  %v337_v15 = vld [vmem:[#allocation5 + $0xc0] sm:$0xff]  ;;  %v320_v16 = vld [vmem:[#allocation5 + $0x38] sm:$0xff]  ;;  %s1157_s7 = scalar_lea.hbm %s2188_s5, %s1319_s23  ;;  %s1158_s13 = sshll.u32 %s310_s16, 4  ;;  %s1159_s13 = int_to_ptr.vmem [resolvable:$true] %s1158_s13 }
  0x3d   : > { %405 = vmatpush.xpose.msra.mxu1 %v343_v3  ;;  %v336_v17 = vld [vmem:[#allocation5 + $0xb8] sm:$0xff]  ;;  %v319_v18 = vld [vmem:[#allocation5 + $0x30] sm:$0xff]  ;;  %v318_v20 = vld [vmem:[#allocation5 + $0x28] sm:$0xff] }
  0x3e   : > { %v335_v19 = vld [vmem:[#allocation5 + $0xb0] sm:$0xff]  ;;  %v334_v21 = vld [vmem:[#allocation5 + $0xa8] sm:$0xff]  ;;  %v317_v22 = vld [vmem:[#allocation5 + $0x20] sm:$0xff] }
  0x3f   : > { %v333_v23 = vld [vmem:[#allocation5 + $0xa0] sm:$0xff]  ;;  %v316_v24 = vld [vmem:[#allocation5 + $0x18] sm:$0xff]  ;;  %v315_v26 = vld [vmem:[#allocation5 + $0x10] sm:$0xff] }
  0x40   : > { %383 = vmatpush.xpose.msra.mxu0 %v326_v4  ;;  %v332_v25 = vld [vmem:[#allocation5 + $0x98] sm:$0xff]  ;;  %v331_v27 = vld [vmem:[#allocation5 + $0x90] sm:$0xff]  ;;  %v314_v28 = vld [vmem:[#allocation5 + $0x8] sm:$0xff] }
  0x41   : > { %406 = vmatpush.xpose.msra.mxu1 %v342_v5  ;;  %v330_v29 = vld [vmem:[#allocation5 + $0x88] sm:$0xff]  ;;  %v313_v30 = vld [vmem:[#allocation5] sm:$0xff]  ;;  %v1941_v47 = vld [vmem:[#allocation10] sm:$0xff] }
  0x42   : > { %v329_v31 = vld [vmem:[#allocation5 + $0x80] sm:$0xff]  ;;  %v1893_v33 = vld [vmem:[%s1873_s17 + $0x8] sm:$0xff] }
  0x43   : > { %v1888_v32 = vld [vmem:[%s1873_s17] sm:$0xff]  ;;  %v1926_v41 = vld [vmem:[#allocation8 + $0x8] sm:$0xff]  ;;  %v1946_v51 = vld [vmem:[#allocation10 + $0x8] sm:$0xff]  ;;  %s1160_s17 = sshll.u32 %s1157_s7, 4  ;;  %s1161_s17 = int_to_ptr.hbm [resolvable:$true] %s1160_s17 }
  0x44   : > { %384 = vmatpush.xpose.msra.mxu0 %v325_v6  ;;  %v1935_v43 = vld [vmem:[#allocation8] sm:$0xff] }
  0x45   : > { %407 = vmatpush.xpose.msra.mxu1 %v341_v7 }
  0x48   : > { %385 = vmatpush.xpose.msra.mxu0 %v324_v8  ;;  %v360_v8 = vld [vmem:[#allocation5 + $0x178] sm:$0xff] }
  0x49   : > { %408 = vmatpush.xpose.msra.mxu1 %v340_v9  ;;  %427 = vmatpush.xpose.msra.mxu2 %v360_v8 }
  0x4c   : > { %386 = vmatpush.xpose.msra.mxu0 %v323_v10 }
  0x4d   : > { %409 = vmatpush.xpose.msra.mxu1 %v339_v11 }
  0x50   : > { %387 = vmatpush.xpose.msra.mxu0 %v322_v12 }
  0x51   : > { %410 = vmatpush.xpose.msra.mxu1 %v338_v13  ;;  %v359_v13 = vld [vmem:[#allocation5 + $0x170] sm:$0xff] }
  0x52   : > { %428 = vmatpush.xpose.msra.mxu2 %v359_v13 }
  0x54   : > { %388 = vmatpush.xpose.msra.mxu0 %v321_v14 }
  0x55   : > { %411 = vmatpush.xpose.msra.mxu1 %v337_v15  ;;  %v358_v15 = vld [vmem:[#allocation5 + $0x168] sm:$0xff] }
  0x56   : > { %429 = vmatpush.xpose.msra.mxu2 %v358_v15 }
  0x58   : > { %389 = vmatpush.xpose.msra.mxu0 %v320_v16 }
  0x59   : > { %412 = vmatpush.xpose.msra.mxu1 %v336_v17 }
  0x5c   : > { %390 = vmatpush.xpose.msra.mxu0 %v319_v18 }
  0x5d   : > { %413 = vmatpush.xpose.msra.mxu1 %v335_v19 }
  0x60   : > { %391 = vmatpush.xpose.msra.mxu0 %v318_v20  ;;  %v357_v20 = vld [vmem:[#allocation5 + $0x160] sm:$0xff] }
  0x61   : > { %414 = vmatpush.xpose.msra.mxu1 %v334_v21  ;;  %430 = vmatpush.xpose.msra.mxu2 %v357_v20 }
  0x64   : > { %392 = vmatpush.xpose.msra.mxu0 %v317_v22 }
  0x65   : > { %415 = vmatpush.xpose.msra.mxu1 %v333_v23 }
  0x68   : > { %393 = vmatpush.xpose.msra.mxu0 %v316_v24 }
  0x69   : > { %416 = vmatpush.xpose.msra.mxu1 %v332_v25 }
  0x6c   : > { %394 = vmatpush.xpose.msra.mxu0 %v315_v26  ;;  %v356_v26 = vld [vmem:[#allocation5 + $0x158] sm:$0xff] }
  0x6d   : > { %417 = vmatpush.xpose.msra.mxu1 %v331_v27  ;;  %431 = vmatpush.xpose.msra.mxu2 %v356_v26 }
  0x70   : > { %395 = vmatpush.xpose.msra.mxu0 %v314_v28 }
  0x71   : > { %418 = vmatpush.xpose.msra.mxu1 %v330_v29 }
  0x74   : > { %396 = vmatpush.xpose.msra.mxu0 %v313_v30 }
  0x75   : > { %419 = vmatpush.xpose.msra.mxu1 %v329_v31  ;;  %v355_v31 = vld [vmem:[#allocation5 + $0x150] sm:$0xff] }
  0x76   : > { %432 = vmatpush.xpose.msra.mxu2 %v355_v31 }
  0x77   : > { %397 = vmatmul.f32.vlgmr.msra.gmra.mxu0 %v1888_v32 }
  0x78   : > { %420 = vmatmul.f32.vlgmr.msra.gmra.mxu1 %v1888_v32 }
  0x7f   : > { %400 = vmatmul.f32.gmra.mxu0 %v1893_v33 }
  0x80   : > { %423 = vmatmul.f32.gmra.mxu1 %v1893_v33 }
  0xf4   : > { %v1897_v34 = vpop.f32.mrf.mxu0 }
  0xf5   : > { %v1899_v35 = vpop.f32.mrf.mxu1  ;;  %v1905_v37 = vsub.f32 0.0, %v1897_v34 }
  0xf6   : > { %v1902_v36 = vsub.f32 0.0, %v1899_v35  ;;  %v477_v27 = vmul.f32 %v1899_v35, %v1935_v43 }
  0xf7   : > { %602 = vrot.lane.b32.xlu2 %v1905_v37, %s1699_s24 }
  0xf8   : > { %630 = vrot.lane.b32.xlu1 %v1902_v36, %s1699_s24 }
  0xfc   : > { %v1922_v40 = vpop.f32.mrf.mxu0 }
  0xfd   : > { %v1911_v38 = vpop.f32.mrf.mxu1  ;;  %v1933_v42 = vsub.f32 0.0, %v1922_v40 }
  0xfe   : > { %v1914_v39 = vsub.f32 0.0, %v1911_v38  ;;  %v478_v23 = vmul.f32 %v1911_v38, %v1926_v41 }
  0xff   : > { %608 = vrot.lane.b32.xlu2 %v1897_v34, %s1700_s29 }
 0x100   : > { %636 = vrot.lane.b32.xlu1 %v1899_v35, %s1700_s29  ;;  %632 = vrot.lane.b32.xlu0 %v1914_v39, %s1699_s24 }
 0x107   : > { %596 = vrot.lane.b32.xlu2 %v1926_v41, %s1701_s12 }
 0x108   : > { %638 = vrot.lane.b32.xlu0 %v1911_v38, %s1700_s29  ;;  %610 = vrot.lane.b32.xlu1 %v1922_v40, %s1700_s29 }
 0x110   : > { %594 = vrot.lane.b32.xlu1 %v1935_v43, %s1701_s12  ;;  %604 = vrot.lane.b32.xlu0 %v1933_v42, %s1699_s24 }
 0x151   : > { %v603_v50 = vpop.permute.xlu2 %602 }
 0x159   : > { %v609_v55 = vpop.permute.xlu2 %608 }
 0x15a   : > { %v614_v56 = vsel %vm470_vm0, %v603_v50, %v609_v55  ;;  %v451_v55 = vmul.f32 %v1922_v40, %v1926_v41 }
 0x15b   : > { %v616_v60 = vmul.f32 %v614_v56, %v1941_v47  ;;  %v352_v56 = vld [vmem:[#allocation5 + $0x138] sm:$0xff] }
 0x161   : > { %v597_v62 = vpop.permute.xlu2 %596 }
 0x162   : > { %v629_v3 = vmul.f32 %v597_v62, %v1911_v38  ;;  %v601_v9 = vmul.f32 %v597_v62, %v1922_v40  ;;  %v345_v62 = vld [vmem:[#allocation5 + $0x100] sm:$0xff] }
 0x16a   : > { %v631_v44 = vpop.permute.xlu1 %630 }
 0x172   : > { %v637_v45 = vpop.permute.xlu1 %636  ;;  %v633_v46 = vpop.permute.xlu0 %632 }
 0x173   : > { %v642_v48 = vsel %vm470_vm0, %v631_v44, %v637_v45 }
 0x174   : > { %v644_v49 = vmul.f32 %v642_v48, %v1941_v47  ;;  %v354_v48 = vld [vmem:[#allocation5 + $0x148] sm:$0xff] }
 0x175   : > { %433 = vmatpush.xpose.msra.mxu2 %v354_v48 }
 0x176   : > { %648 = vrot.lane.b32.xlu2 %v644_v49, %s1701_s12 }
 0x17a   : > { %v639_v52 = vpop.permute.xlu0 %638  ;;  %v611_v57 = vpop.permute.xlu1 %610 }
 0x17b   : > { %v643_v53 = vsel %vm470_vm0, %v633_v46, %v639_v52 }
 0x17c   : > { %v645_v54 = vmul.f32 %v643_v53, %v1946_v51  ;;  %v353_v53 = vld [vmem:[#allocation5 + $0x140] sm:$0xff] }
 0x17d   : > { %434 = vmatpush.xpose.msra.mxu2 %v353_v53 }
 0x17e   : > { %485 = vrot.lane.b32.xlu2 %v1914_v39, %s1700_s29  ;;  %650 = vrot.lane.b32.xlu0 %v645_v54, %s1701_s12 }
 0x181   : > { %435 = vmatpush.xpose.msra.mxu2 %v352_v56 }
 0x182   : > { %v605_v58 = vpop.permute.xlu0 %604  ;;  %v595_v63 = vpop.permute.xlu1 %594 }
 0x183   : > { %v615_v59 = vsel %vm470_vm0, %v605_v58, %v611_v57  ;;  %v628_v0 = vmul.f32 %v595_v63, %v1899_v35  ;;  %v600_v6 = vmul.f32 %v595_v63, %v1897_v34  ;;  %v351_v57 = vld [vmem:[#allocation5 + $0x130] sm:$0xff]  ;;  %v350_v58 = vld [vmem:[#allocation5 + $0x128] sm:$0xff] }
 0x184   : > { %v617_v61 = vmul.f32 %v615_v59, %v1946_v51  ;;  %v349_v59 = vld [vmem:[#allocation5 + $0x120] sm:$0xff] }
 0x185   : > { %436 = vmatpush.xpose.msra.mxu2 %v351_v57 }
 0x186   : > { %491 = vrot.lane.b32.xlu2 %v1899_v35, %s1702_s30  ;;  %620 = vrot.lane.b32.xlu0 %v616_v60, %s1701_s12  ;;  %v348_v60 = vld [vmem:[#allocation5 + $0x118] sm:$0xff] }
 0x187   : > { %622 = vrot.lane.b32.xlu1 %v617_v61, %s1701_s12  ;;  %v347_v61 = vld [vmem:[#allocation5 + $0x110] sm:$0xff] }
 0x189   : > { %437 = vmatpush.xpose.msra.mxu2 %v350_v58 }
 0x18d   : > { %438 = vmatpush.xpose.msra.mxu2 %v349_v59 }
 0x18e   : > { %458 = vrot.lane.b32.xlu2 %v1933_v42, %s1700_s29  ;;  %493 = vrot.lane.b32.xlu0 %v1911_v38, %s1702_s30 }
 0x18f   : > { %483 = vrot.lane.b32.xlu1 %v1902_v36, %s1700_s29 }
 0x191   : > { %439 = vmatpush.xpose.msra.mxu2 %v348_v60 }
 0x195   : > { %440 = vmatpush.xpose.msra.mxu2 %v347_v61 }
 0x196   : > { %456 = vrot.lane.b32.xlu0 %v1905_v37, %s1700_s29  ;;  %s1631_s29 = sshra.s32 %s1161_s17, 4  ;;  %s1632_s29 = int_to_ptr.hbm [resolvable:$true] %s1631_s29 }
 0x197   : > { %464 = vrot.lane.b32.xlu1 %v1897_v34, %s1702_s30  ;;  %p1638_p11 = scmp.lt.s32.totalorder %s1632_s29, %s2188_s5 }
 0x19e   : > { %466 = vrot.lane.b32.xlu0 %v1922_v40, %s1702_s30 }
 0x1d0   : > { %v649_v1 = vpop.permute.xlu2 %648 }
 0x1d1   : > { %v654_v2 = vadd.f32 %v649_v1, %v628_v0 }
 0x1d3   : > { %664 = vrot.lane.b32.xlu2 %v654_v2, %s1703_s6 }
 0x1d8   : > { %v486_v7 = vpop.permute.xlu2 %485 }
 0x1db   : > { %798 = vrot.lane.b32.xlu2 %v1914_v39, %s1704_s8 }
 0x1e0   : > { %v492_v17 = vpop.permute.xlu2 %491 }
 0x1e3   : > { %968 = vrot.lane.b32.xlu2 %v1911_v38, %s1704_s8 }
 0x1e8   : > { %v459_v49 = vpop.permute.xlu2 %458 }
 0x1eb   : > { %960 = vrot.lane.b32.xlu2 %v1902_v36, %s1702_s30 }
 0x1f0   : > { %v651_v4 = vpop.permute.xlu0 %650 }
 0x1f1   : > { %v655_v5 = vadd.f32 %v651_v4, %v629_v3 }
 0x1f3   : > { %774 = vrot.lane.b32.xlu2 %v1897_v34, %s1699_s24  ;;  %666 = vrot.lane.b32.xlu1 %v655_v5, %s1703_s6 }
 0x1f8   : > { %v621_v10 = vpop.permute.xlu0 %620 }
 0x1f9   : > { %v623_v11 = vpop.permute.xlu1 %622  ;;  %v626_v12 = vadd.f32 %v621_v10, %v600_v6 }
 0x1fa   : > { %v627_v14 = vadd.f32 %v623_v11, %v601_v9 }
 0x1fb   : > { %770 = vrot.lane.b32.xlu2 %v1933_v42, %s1704_s8  ;;  %658 = vrot.lane.b32.xlu0 %v626_v12, %s1703_s6 }
 0x1fc   : > { %660 = vrot.lane.b32.xlu1 %v627_v14, %s1703_s6 }
 0x200   : > { %v494_v16 = vpop.permute.xlu0 %493 }
 0x201   : > { %v484_v18 = vpop.permute.xlu1 %483  ;;  %v498_v19 = vsel %vm470_vm0, %v486_v7, %v494_v16 }
 0x202   : > { %v497_v21 = vsel %vm470_vm0, %v484_v18, %v492_v17  ;;  %v500_v22 = vmul.f32 %v498_v19, %v1946_v51 }
 0x203   : > { %940 = vrot.lane.b32.xlu2 %v1922_v40, %s1704_s8  ;;  %804 = vrot.lane.b32.xlu0 %v1911_v38, %s1699_s24  ;;  %v499_v24 = vmul.f32 %v497_v21, %v1941_v47 }
 0x204   : > { %962 = vrot.lane.b32.xlu1 %v1914_v39, %s1702_s30  ;;  %v502_v25 = vadd.f32 %v500_v22, %v478_v23  ;;  %v450_v39 = vmul.f32 %v1897_v34, %v1935_v43 }
 0x205   : > { %v501_v29 = vadd.f32 %v499_v24, %v477_v27 }
 0x206   : > { %1289 = vmatpush.xpose.msk.msrb.mxu0 %vm503_vm1, %v502_v25 }
 0x208   : > { %v457_v28 = vpop.permute.xlu0 %456 }
 0x209   : > { %v465_v30 = vpop.permute.xlu1 %464 }
 0x20a   : > { %v471_v44 = vsel %vm470_vm0, %v457_v28, %v465_v30  ;;  %1290 = vmatpush.xpose.msk.msrb.mxu0 %vm503_vm1, %v501_v29 }
 0x20b   : > { %v473_v45 = vmul.f32 %v471_v44, %v1941_v47  ;;  %796 = vrot.lane.b32.xlu0 %v1902_v36, %s1704_s8 }
 0x20c   : > { %802 = vrot.lane.b32.xlu1 %v1899_v35, %s1699_s24 }
 0x20d   : > { %v475_v46 = vadd.f32 %v473_v45, %v450_v39 }
 0x20f   : > { %1291 = vmatmul.msk.f32.vlgmr.msrb.gmra.mxu0 %vm503_vm1, %v475_v46 }
 0x210   : > { %v467_v50 = vpop.permute.xlu0 %466 }
 0x211   : > { %v472_v52 = vsel %vm470_vm0, %v459_v49, %v467_v50 }
 0x212   : > { %v474_v54 = vmul.f32 %v472_v52, %v1946_v51 }
 0x213   : > { %966 = vrot.lane.b32.xlu0 %v1899_v35, %s1704_s8 }
 0x214   : > { %768 = vrot.lane.b32.xlu1 %v1905_v37, %s1704_s8  ;;  %v476_v36 = vadd.f32 %v474_v54, %v451_v55 }
 0x217   : > { %1292 = vmatmul.msk.f32.gmra.mxu0 %vm503_vm1, %v476_v36 }
 0x21b   : > { %932 = vrot.lane.b32.xlu0 %v1905_v37, %s1702_s30  ;;  %v346_v37 = vld [vmem:[#allocation5 + $0x108] sm:$0xff] }
 0x21c   : > { %938 = vrot.lane.b32.xlu1 %v1897_v34, %s1704_s8  ;;  %441 = vmatpush.xpose.msra.mxu2 %v346_v37 }
 0x220   : > { %442 = vmatpush.xpose.msra.mxu2 %v345_v62 }
 0x223   : > { %776 = vrot.lane.b32.xlu0 %v1922_v40, %s1699_s24  ;;  %443 = vmatmul.f32.vlgmr.msra.gmra.mxu2 %v1888_v32  ;;  %s1146_s24 = scalar_lea.sflag [#allocation4], %s1867_s28 }
 0x224   : > { %934 = vrot.lane.b32.xlu1 %v1933_v42, %s1702_s30  ;;  %s1637_s30 = scalar_lea.hbm %s2188_s5, 32 }
 0x22b   : > { %762 = vrot.lane.b32.xlu0 %v1926_v41, %s1705_s10  ;;  %446 = vmatmul.f32.gmra.mxu2 %v1893_v33 }
 0x22c   : > { %926 = vrot.lane.b32.xlu1 %v1926_v41, %s1703_s6 }
 0x22d   : > { %v665_v42 = vpop.permute.xlu2 %664 }
 0x234   : > { %760 = vrot.lane.b32.xlu1 %v1935_v43, %s1705_s10 }
 0x235   : > { %v799_v63 = vpop.permute.xlu2 %798 }
 0x23d   : > { %v969_v1 = vpop.permute.xlu2 %968 }
 0x245   : > { %v961_v6 = vpop.permute.xlu2 %960 }
 0x24d   : > { %v775_v12 = vpop.permute.xlu2 %774 }
 0x255   : > { %v771_v19 = vpop.permute.xlu2 %770 }
 0x25d   : > { %v941_v24 = vpop.permute.xlu2 %940 }
 0x265   : > { %v667_v0 = vpop.permute.xlu1 %666 }
 0x266   : > { %1295 = vmatpush.xpose.msk.msrb.mxu1 %vm503_vm1, %v667_v0 }
 0x26a   : > { %1296 = vmatpush.xpose.msk.msrb.mxu1 %vm503_vm1, %v665_v42 }
 0x26d   : > { %v659_v41 = vpop.permute.xlu0 %658 }
 0x26e   : > { %v661_v2 = vpop.permute.xlu1 %660  ;;  %1297 = vmatmul.msk.f32.vlgmr.msrb.gmra.mxu1 %vm503_vm1, %v659_v41 }
 0x275   : > { %v805_v3 = vpop.permute.xlu0 %804 }
 0x276   : > { %v963_v4 = vpop.permute.xlu1 %962  ;;  %v809_v5 = vsel %vm470_vm0, %v799_v63, %v805_v3  ;;  %1298 = vmatmul.msk.f32.gmra.mxu1 %vm503_vm1, %v661_v2 }
 0x277   : > { %v973_v32 = vsel %vm470_vm0, %v963_v4, %v969_v1  ;;  %v811_v33 = vmul.f32 %v809_v5, %v1946_v51 }
 0x278   : > { %v975_v7 = vmul.f32 %v973_v32, %v1946_v51 }
 0x279   : > { %816 = vrot.lane.b32.xlu2 %v811_v33, %s1705_s10 }
 0x27a   : > { %980 = vrot.lane.b32.xlu0 %v975_v7, %s1703_s6 }
 0x27d   : > { %v797_v8 = vpop.permute.xlu0 %796 }
 0x27e   : > { %v803_v9 = vpop.permute.xlu1 %802 }
 0x27f   : > { %v808_v10 = vsel %vm470_vm0, %v797_v8, %v803_v9 }
 0x280   : > { %v810_v11 = vmul.f32 %v808_v10, %v1941_v47 }
 0x281   : > { %924 = vrot.lane.b32.xlu2 %v1935_v43, %s1703_s6 }
 0x282   : > { %814 = vrot.lane.b32.xlu0 %v810_v11, %s1705_s10 }
 0x285   : > { %v967_v13 = vpop.permute.xlu0 %966 }
 0x286   : > { %v769_v14 = vpop.permute.xlu1 %768  ;;  %v972_v15 = vsel %vm470_vm0, %v961_v6, %v967_v13 }
 0x287   : > { %v780_v16 = vsel %vm470_vm0, %v769_v14, %v775_v12  ;;  %v974_v17 = vmul.f32 %v972_v15, %v1941_v47 }
 0x288   : > { %v782_v18 = vmul.f32 %v780_v16, %v1941_v47 }
 0x289   : > { %978 = vrot.lane.b32.xlu1 %v974_v17, %s1703_s6 }
 0x28a   : > { %786 = vrot.lane.b32.xlu2 %v782_v18, %s1705_s10 }
 0x28c   : > { %v533_v60 = vpop.f32.mrf.mxu0 }
 0x28d   : > { %v933_v20 = vpop.permute.xlu0 %932 }
 0x28e   : > { %v939_v43 = vpop.permute.xlu1 %938 }
 0x28f   : > { %v944_v21 = vsel %vm470_vm0, %v933_v20, %v939_v43 }
 0x290   : > { %v946_v22 = vmul.f32 %v944_v21, %v1941_v47 }
 0x292   : > { %950 = vrot.lane.b32.xlu0 %v946_v22, %s1703_s6 }
 0x294   : > { %v536_v42 = vpop.f32.mrf.mxu0 }
 0x295   : > { %v777_v23 = vpop.permute.xlu0 %776  ;;  %v540_v63 = vmul.f32 0.17677669, %v536_v42 }
 0x296   : > { %v935_v25 = vpop.permute.xlu1 %934  ;;  %v781_v26 = vsel %vm470_vm0, %v771_v19, %v777_v23 }
 0x297   : > { %v945_v27 = vsel %vm470_vm0, %v935_v25, %v941_v24  ;;  %v783_v28 = vmul.f32 %v781_v26, %v1946_v51 }
 0x298   : > { %v947_v29 = vmul.f32 %v945_v27, %v1946_v51 }
 0x299   : > { %788 = vrot.lane.b32.xlu2 %v783_v28, %s1705_s10 }
 0x29a   : > { %952 = vrot.lane.b32.xlu0 %v947_v29, %s1703_s6 }
 0x29d   : > { %v763_v44 = vpop.permute.xlu0 %762 }
 0x29e   : > { %v927_v39 = vpop.permute.xlu1 %926  ;;  %v795_v57 = vmul.f32 %v763_v44, %v1911_v38  ;;  %v767_v11 = vmul.f32 %v763_v44, %v1922_v40 }
 0x29f   : > { %v959_v45 = vmul.f32 %v927_v39, %v1911_v38  ;;  %v931_v8 = vmul.f32 %v927_v39, %v1922_v40 }
 0x2a6   : > { %v444_v30 = vpop.f32.mrf.mxu2  ;;  %v761_v49 = vpop.permute.xlu1 %760 }
 0x2a7   : > { %v794_v50 = vmul.f32 %v761_v49, %v1899_v35  ;;  %v766_v4 = vmul.f32 %v761_v49, %v1897_v34 }
 0x2ae   : > { %v447_v31 = vpop.f32.mrf.mxu2 }
 0x2af   : > { %581 = vmatpush.msrb.mxu2 %v447_v31  ;;  %1320 = vmatpush.msra.mxu3 %v447_v31  ;;  %v2071_v47 = vpack.i.bf16 %v444_v30, %v447_v31 }
 0x2b1   : > { %582 = vmatpush.msrb.mxu2 %v444_v30  ;;  %1321 = vmatpush.msra.mxu3 %v444_v30 }
 0x2b2   : > { %1421 = vrot.lane.b32.xlu1 %v2071_v47, %s1703_s6 }
 0x2d3   : > { %v817_v46 = vpop.permute.xlu2 %816 }
 0x2d4   : > { %v821_v58 = vadd.f32 %v817_v46, %v795_v57 }
 0x2db   : > { %v925_v54 = vpop.permute.xlu2 %924 }
 0x2dc   : > { %v958_v55 = vmul.f32 %v925_v54, %v1899_v35  ;;  %v544_v35 = vsel %vm470_vm0, %v540_v63, -inf  ;;  %v930_v41 = vmul.f32 %v925_v54, %v1897_v34  ;;  %v539_v34 = vmul.f32 0.17677669, %v533_v60 }
 0x2de   : > { %v541_v13 = vsel %vm470_vm0, %v539_v34, -inf }
 0x2e4   : > { %v787_v3 = vpop.permute.xlu2 %786 }
 0x2e5   : > { %v792_v5 = vadd.f32 %v787_v3, %v766_v4 }
 0x2eb   : > { %v693_v59 = vpop.f32.mrf.mxu1 }
 0x2ec   : > { %v981_v51 = vpop.permute.xlu0 %980  ;;  %v699_v1 = vmul.f32 0.17677669, %v693_v59 }
 0x2ed   : > { %v985_v48 = vadd.f32 %v981_v51, %v959_v45 }
 0x2ee   : > { %v701_v2 = vsel %vm470_vm0, %v699_v1, -inf }
 0x2ef   : > { %996 = vrot.lane.b32.xlu0 %v985_v48, %s1701_s12 }
 0x2f3   : > { %v696_v61 = vpop.f32.mrf.mxu1  ;;  %v789_v10 = vpop.permute.xlu2 %788 }
 0x2f4   : > { %v815_v52 = vpop.permute.xlu0 %814  ;;  %v700_v37 = vmul.f32 0.17677669, %v696_v61  ;;  %v793_v12 = vadd.f32 %v789_v10, %v767_v11 }
 0x2f5   : > { %v820_v53 = vadd.f32 %v815_v52, %v794_v50 }
 0x2f6   : > { %v704_v62 = vsel %vm470_vm0, %v700_v37, -inf }
 0x2f7   : > { %830 = vrot.lane.b32.xlu1 %v820_v53, %s1705_s10 }
 0x2fb   : > { %v979_v36 = vpop.permute.xlu1 %978 }
 0x2fc   : > { %v984_v56 = vadd.f32 %v979_v36, %v958_v55 }
 0x2fe   : > { %994 = vrot.lane.b32.xlu2 %v984_v56, %s1701_s12 }
 0x304   : > { %v951_v0 = vpop.permute.xlu0 %950 }
 0x305   : > { %v956_v38 = vadd.f32 %v951_v0, %v930_v41 }
 0x306   : > { %832 = vrot.lane.b32.xlu2 %v821_v58, %s1705_s10 }
 0x30c   : > { %v953_v7 = vpop.permute.xlu0 %952 }
 0x30d   : > { %v957_v9 = vadd.f32 %v953_v7, %v931_v8 }
 0x319   : > { %705 = vmax.xlane.f32.xlu0 %v704_v62 }
 0x321   : > { %545 = vmax.xlane.f32.xlu1 %v544_v35 }
 0x324   : > { %v1422_v32 = vpop.permute.xlu1 %1421 }
 0x325   : > { %v1423_v33 = vunpack.i.l.bf16 %v1422_v32  ;;  %v1424_v6 = vunpack.i.h.bf16 %v1422_v32 }
 0x327   : > { %749 = vmatpush.msrb.mxu3 %v1423_v33 }
 0x329   : > { %750 = vmatpush.msrb.mxu3 %v1424_v6 }
 0x32d   : > { %988 = vrot.lane.b32.xlu0 %v956_v38, %s1701_s12 }
 0x32f   : > { %702 = vmax.xlane.f32.xlu2 %v701_v2 }
 0x33a   : > { %824 = vrot.lane.b32.xlu1 %v792_v5, %s1705_s10 }
 0x342   : > { %990 = vrot.lane.b32.xlu1 %v957_v9, %s1701_s12 }
 0x347   : > { %826 = vrot.lane.b32.xlu2 %v793_v12, %s1705_s10 }
 0x357   : > { %542 = vmax.xlane.f32.xlu0 %v541_v13 }
 0x358   : > { %v995_v15 = vpop.permute.xlu2 %994 }
 0x360   : > { %v833_v40 = vpop.permute.xlu2 %832 }
 0x361   : > { %v997_v14 = vpop.permute.xlu0 %996 }
 0x362   : > { %1307 = vmatpush.xpose.msk.msra.mxu1 %vm503_vm1, %v997_v14 }
 0x366   : > { %1308 = vmatpush.xpose.msk.msra.mxu1 %vm503_vm1, %v995_v15 }
 0x369   : > { %v831_v16 = vpop.permute.xlu1 %830 }
 0x38c   : > { %v706_v19 = vpop.xlane.xlu0 %705 }
 0x38d   : > { %v708_v25 = vsub.f32 %v700_v37, %v706_v19 }
 0x38f   : > { %v711_v26 = vmul.f32 1.442695, %v708_v25 }
 0x394   : > { %v546_v17 = vpop.xlane.xlu1 %545 }
 0x395   : > { %v548_v18 = vsub.f32 %v540_v63, %v546_v17 }
 0x397   : > { %v551_v20 = vmul.f32 1.442695, %v548_v18 }
 0x399   : > { %1435 = vpow2.f32 %v551_v20 }
 0x39f   : > { %v2097_v43 = vpop.eup %1435  ;;  %v989_v21 = vpop.permute.xlu0 %988 }
 0x3a0   : > { %1294 = vmatmul.msk.f32.vlgmr.msra.gmra.mxu3 %vm470_vm0, %v2097_v43  ;;  %1309 = vmatmul.msk.f32.vlgmr.msra.gmra.mxu1 %vm503_vm1, %v989_v21  ;;  %v556_v15 = vsel %vm470_vm0, %v2097_v43, 0.0 }
 0x3a1   : > { %1301 = vmatpush.xpose.msk.msra.mxu3 %vm503_vm1, %v833_v40 }
 0x3a2   : > { %v703_v22 = vpop.xlane.xlu2 %702 }
 0x3a3   : > { %v707_v23 = vsub.f32 %v699_v1, %v703_v22 }
 0x3a5   : > { %v709_v24 = vmul.f32 1.442695, %v707_v23  ;;  %1302 = vmatpush.xpose.msk.msra.mxu3 %vm503_vm1, %v831_v16 }
 0x3a7   : > { %1437 = vpow2.f32 %v709_v24 }
 0x3a8   : > { %1439 = vpow2.f32 %v711_v26 }
 0x3aa   : > { %v827_v31 = vpop.permute.xlu2 %826 }
 0x3ac   : > { %v825_v27 = vpop.permute.xlu1 %824 }
 0x3ad   : > { %v1438_v28 = vpop.eup %1437 }
 0x3ae   : > { %1299 = vmatmul.msk.f32.vlgmr.msrb.gmra.mxu3 %vm470_vm0, %v1438_v28  ;;  %v1440_v30 = vpop.eup %1439  ;;  %v713_v37 = vsel %vm470_vm0, %v1438_v28, 0.0 }
 0x3af   : > { %v716_v62 = vsel %vm470_vm0, %v1440_v30, 0.0 }
 0x3b4   : > { %v991_v29 = vpop.permute.xlu1 %990 }
 0x3b5   : > { %1310 = vmatmul.msk.f32.gmra.mxu1 %vm503_vm1, %v991_v29 }
 0x3b6   : > { %1300 = vmatmul.msk.f32.gmra.mxu3 %vm470_vm0, %v1440_v30 }
 0x3be   : > { %1303 = vmatmul.msk.f32.vlgmr.msra.gmra.mxu3 %vm503_vm1, %v825_v27 }
 0x3c6   : > { %1304 = vmatmul.msk.f32.gmra.mxu3 %vm503_vm1, %v827_v31 }
 0x3ca   : > { %v543_v44 = vpop.xlane.xlu0 %542 }
 0x3cb   : > { %v547_v39 = vsub.f32 %v539_v34, %v543_v44 }
 0x3cd   : > { %v549_v45 = vmul.f32 1.442695, %v547_v39 }
 0x3cf   : > { %1441 = vpow2.f32 %v549_v45  ;;  %v376_v45 = vld [vmem:[#allocation7 + $0x78] sm:$0xff] }
 0x3d0   : > { %1120 = vmatpush.xpose.msrb.mxu3 %v376_v45 }
 0x3d5   : > { %v1442_v51 = vpop.eup %1441 }
 0x3d6   : > { %1293 = vmatmul.msk.f32.vlgmr.msrb.gmra.mxu2 %vm470_vm0, %v1442_v51  ;;  %v553_v10 = vsel %vm470_vm0, %v1442_v51, 0.0 }
 0x41d   : > { %v1023_v46 = vpop.f32.mrf.mxu1 }
 0x41e   : > { %v1029_v48 = vmul.f32 0.17677669, %v1023_v46 }
 0x420   : > { %v1031_v49 = vsel %vm470_vm0, %v1029_v48, -inf }
 0x421   : > { %1032 = vmax.xlane.f32.xlu2 %v1031_v49 }
 0x423   : > { %v2111_v50 = vpop.f32.mrf.mxu3 }
 0x431   : > { %v2113_v52 = vpop.f32.mrf.mxu3 }
 0x432   : > { %v1026_v53 = vpop.f32.mrf.mxu1 }
 0x433   : > { %v1030_v54 = vmul.f32 0.17677669, %v1026_v53  ;;  %v374_v53 = vld [vmem:[#allocation7 + $0x68] sm:$0xff] }
 0x435   : > { %v1034_v55 = vsel %vm470_vm0, %v1030_v54, -inf }
 0x436   : > { %1035 = vmax.xlane.f32.xlu0 %v1034_v55 }
 0x439   : > { %1426 = vrot.lane.b32.xlu2 %v2071_v47, %s1701_s12  ;;  %v2118_v36 = vpop.f32.mrf.mxu3 }
 0x441   : > { %v859_v56 = vpop.f32.mrf.mxu3 }
 0x442   : > { %v865_v57 = vmul.f32 0.17677669, %v859_v56 }
 0x444   : > { %v867_v58 = vsel %vm470_vm0, %v865_v57, -inf }
 0x445   : > { %868 = vmax.xlane.f32.xlu1 %v867_v58 }
 0x449   : > { %v862_v59 = vpop.f32.mrf.mxu3 }
 0x44a   : > { %v866_v60 = vmul.f32 0.17677669, %v862_v59  ;;  %1431 = vrot.lane.b32.xlu0 %v2071_v47, %s1705_s10  ;;  %v373_v59 = vld [vmem:[#allocation7 + $0x60] sm:$0xff] }
 0x44c   : > { %v870_v61 = vsel %vm470_vm0, %v866_v60, -inf }
 0x44d   : > { %871 = vmax.xlane.f32.xlu1 %v870_v61  ;;  %v371_v61 = vld [vmem:[#allocation7 + $0x50] sm:$0xff] }
 0x455   : > { %714 = vadd.xlane.f32.xlu1 %v713_v37  ;;  %v370_v37 = vld [vmem:[#allocation7 + $0x48] sm:$0xff] }
 0x459   : > { %v584_v24 = vpop.f32.mrf.mxu2 }
 0x474   : > { %717 = vadd.xlane.f32.xlu0 %v716_v62  ;;  %v369_v62 = vld [vmem:[#allocation7 + $0x40] sm:$0xff] }
 0x494   : > { %v1033_v42 = vpop.xlane.xlu2 %1032 }
 0x495   : > { %v1037_v63 = vsub.f32 %v1029_v48, %v1033_v42  ;;  %v368_v42 = vld [vmem:[#allocation7 + $0x38] sm:$0xff] }
 0x497   : > { %v1039_v35 = vmul.f32 1.442695, %v1037_v63  ;;  %v367_v63 = vld [vmem:[#allocation7 + $0x30] sm:$0xff] }
 0x499   : > { %1443 = vpow2.f32 %v1039_v35  ;;  %v366_v35 = vld [vmem:[#allocation7 + $0x28] sm:$0xff] }
 0x49c   : > { %v1427_v0 = vpop.permute.xlu2 %1426 }
 0x49d   : > { %v1428_v41 = vunpack.i.l.bf16 %v1427_v0  ;;  %v1429_v38 = vunpack.i.h.bf16 %v1427_v0  ;;  %v365_v0 = vld [vmem:[#allocation7 + $0x20] sm:$0xff] }
 0x49f   : > { %v1444_v1 = vpop.eup %1443  ;;  %1077 = vmatpush.msra.mxu2 %v1428_v41  ;;  %v364_v41 = vld [vmem:[#allocation7 + $0x18] sm:$0xff] }
 0x4a0   : > { %v1043_v47 = vsel %vm470_vm0, %v1444_v1, 0.0 }
 0x4a1   : > { %1044 = vadd.xlane.f32.xlu2 %v1043_v47  ;;  %1078 = vmatpush.msra.mxu2 %v1429_v38  ;;  %v362_v38 = vld [vmem:[#allocation7 + $0x8] sm:$0xff]  ;;  %v361_v47 = vld [vmem:[#allocation7] sm:$0xff] }
 0x4a2   : > { %1311 = vmatmul.msk.f32.vlgmr.msra.gmra.mxu2 %vm470_vm0, %v1444_v1  ;;  %v363_v1 = vld [vmem:[#allocation7 + $0x10] sm:$0xff] }
 0x4a9   : > { %v1036_v2 = vpop.xlane.xlu0 %1035 }
 0x4aa   : > { %v1038_v3 = vsub.f32 %v1030_v54, %v1036_v2 }
 0x4ac   : > { %v1041_v4 = vmul.f32 1.442695, %v1038_v3 }
 0x4ae   : > { %1445 = vpow2.f32 %v1041_v4 }
 0x4b4   : > { %v1446_v5 = vpop.eup %1445 }
 0x4b5   : > { %1312 = vmatmul.msk.f32.gmra.mxu2 %vm470_vm0, %v1446_v5  ;;  %v1046_v32 = vsel %vm470_vm0, %v1446_v5, 0.0 }
 0x4b6   : > { %1047 = vadd.xlane.f32.xlu1 %v1046_v32 }
 0x4b8   : > { %v869_v33 = vpop.xlane.xlu1 %868 }
 0x4b9   : > { %v873_v6 = vsub.f32 %v865_v57, %v869_v33 }
 0x4bb   : > { %v875_v7 = vmul.f32 1.442695, %v873_v6 }
 0x4bc   : > { %v1432_v8 = vpop.permute.xlu0 %1431 }
 0x4bd   : > { %1447 = vpow2.f32 %v875_v7  ;;  %v1433_v9 = vunpack.i.l.bf16 %v1432_v8  ;;  %v1434_v11 = vunpack.i.h.bf16 %v1432_v8 }
 0x4be   : > { %554 = vadd.xlane.f32.xlu1 %v553_v10 }
 0x4bf   : > { %913 = vmatpush.msra.mxu0 %v1433_v9 }
 0x4c0   : > { %v872_v12 = vpop.xlane.xlu1 %871 }
 0x4c1   : > { %914 = vmatpush.msra.mxu0 %v1434_v11  ;;  %v874_v34 = vsub.f32 %v866_v60, %v872_v12  ;;  %v372_v60 = vld [vmem:[#allocation7 + $0x58] sm:$0xff] }
 0x4c3   : > { %v1448_v13 = vpop.eup %1447  ;;  %v877_v14 = vmul.f32 1.442695, %v874_v34 }
 0x4c4   : > { %1305 = vmatmul.msk.f32.vlgmr.msra.gmra.mxu0 %vm470_vm0, %v1448_v13  ;;  %v879_v17 = vsel %vm470_vm0, %v1448_v13, 0.0 }
 0x4c5   : > { %1449 = vpow2.f32 %v877_v14 }
 0x4c6   : > { %557 = vadd.xlane.f32.xlu1 %v556_v15 }
 0x4c8   : > { %v715_v19 = vpop.xlane.xlu1 %714 }
 0x4c9   : > { %1451 = vrcp.f32 %v715_v19 }
 0x4cb   : > { %v1450_v16 = vpop.eup %1449 }
 0x4cc   : > { %1306 = vmatmul.msk.f32.gmra.mxu0 %vm470_vm0, %v1450_v16  ;;  %v882_v18 = vsel %vm470_vm0, %v1450_v16, 0.0 }
 0x4ce   : > { %880 = vadd.xlane.f32.xlu1 %v879_v17 }
 0x4cf   : > { %v1452_v40 = vpop.eup %1451 }
 0x4d0   : > { %v758_v21 = vmul.f32 %v1452_v40, %v2113_v52  ;;  %v375_v52 = vld [vmem:[#allocation7 + $0x70] sm:$0xff] }
 0x4d1   : > { %1121 = vmatpush.xpose.msrb.mxu3 %v375_v52 }
 0x4d5   : > { %1122 = vmatpush.xpose.msrb.mxu3 %v374_v53 }
 0x4d6   : > { %883 = vadd.xlane.f32.xlu1 %v882_v18 }
 0x4d9   : > { %1123 = vmatpush.xpose.msrb.mxu3 %v373_v59 }
 0x4dd   : > { %1124 = vmatpush.xpose.msrb.mxu3 %v372_v60 }
 0x4e1   : > { %1125 = vmatpush.xpose.msrb.mxu3 %v371_v61 }
 0x4e5   : > { %1126 = vmatpush.xpose.msrb.mxu3 %v370_v37 }
 0x4e7   : > { %v718_v20 = vpop.xlane.xlu0 %717 }
 0x4e8   : > { %1453 = vrcp.f32 %v718_v20 }
 0x4e9   : > { %1127 = vmatpush.xpose.msrb.mxu3 %v369_v62 }
 0x4ed   : > { %1128 = vmatpush.xpose.msrb.mxu3 %v368_v42 }
 0x4ee   : > { %v1454_v43 = vpop.eup %1453 }
 0x4ef   : > { %1090 = vrot.lane.b32.xlu1 %v758_v21, %s1701_s12  ;;  %v759_v22 = vmul.f32 %v1454_v43, %v2118_v36 }
 0x4f1   : > { %1129 = vmatpush.xpose.msrb.mxu3 %v367_v63 }
 0x4f5   : > { %1130 = vmatpush.xpose.msrb.mxu3 %v366_v35 }
 0x4f7   : > { %1092 = vrot.lane.b32.xlu1 %v759_v22, %s1701_s12  ;;  %s1633_s12 = scalar_lea.hbm %s1632_s29, 16 }
 0x4f8   : > { %p1634_p1 = scmp.ne.s32.totalorder %s1632_s29, %s1633_s12  ;;  %p1639_p2 = scmp.lt.s32.totalorder %s1637_s30, %s1633_s12 }
 0x4f9   : > { %1131 = vmatpush.xpose.msrb.mxu3 %v365_v0 }
 0x4fa   : > { %p1635_p4 = pnand %p1634_p1, %p1834_p3  ;;  %p1640_p9 = por %p1639_p2, %p1638_p11 }
 0x4fc   : > { %p1636_p8 = pneg %p1635_p4 }
 0x4fd   : > { %1132 = vmatpush.xpose.msrb.mxu3 %v364_v41 }
 0x4fe   : > { %p1641_p10 = pnand %p1640_p9, %p1636_p8 }
 0x501   : > { %1133 = vmatpush.xpose.msrb.mxu3 %v363_v1 }
 0x505   : > { %1134 = vmatpush.xpose.msrb.mxu3 %v362_v38 }
 0x509   : > { %1135 = vmatpush.xpose.msrb.mxu3 %v361_v47 }
 0x514   : > { %v1045_v23 = vpop.xlane.xlu2 %1044 }
 0x515   : > { %1455 = vrcp.f32 %v1045_v23 }
 0x51b   : > { %v1456_v25 = vpop.eup %1455 }
 0x525   : > { %v1080_v26 = vpop.f32.mrf.mxu2 }
 0x526   : > { %v1086_v27 = vmul.f32 %v1456_v25, %v1080_v26 }
 0x528   : > { %1106 = vrot.lane.b32.xlu0 %v1086_v27, %s1703_s6 }
 0x529   : > { %v1048_v28 = vpop.xlane.xlu1 %1047 }
 0x531   : > { %v555_v29 = vpop.xlane.xlu1 %554 }
 0x532   : > { %1457 = vrcp.f32 %v555_v29 }
 0x538   : > { %v1458_v30 = vpop.eup %1457  ;;  %v1083_v54 = vpop.f32.mrf.mxu2 }
 0x539   : > { %v558_v31 = vpop.xlane.xlu1 %557  ;;  %v590_v44 = vmul.f32 %v1458_v30, %v584_v24 }
 0x541   : > { %v881_v39 = vpop.xlane.xlu1 %880  ;;  %v916_v51 = vpop.f32.mrf.mxu0 }
 0x542   : > { %1459 = vrcp.f32 %v881_v39 }
 0x543   : > { %1461 = vrcp.f32 %v1048_v28 }
 0x548   : > { %v1460_v46 = vpop.eup %1459 }
 0x549   : > { %v922_v48 = vmul.f32 %v1460_v46, %v916_v51  ;;  %v884_v49 = vpop.xlane.xlu1 %883  ;;  %v1462_v55 = vpop.eup %1461 }
 0x54a   : > { %1463 = vrcp.f32 %v884_v49  ;;  %v919_v56 = vpop.f32.mrf.mxu0  ;;  %v1087_v57 = vmul.f32 %v1462_v55, %v1083_v54 }
 0x54b   : > { %1098 = vrot.lane.b32.xlu2 %v922_v48, %s1705_s10  ;;  %1465 = vrcp.f32 %v558_v31 }
 0x550   : > { %v1464_v36 = vpop.eup %1463 }
 0x551   : > { %v923_v58 = vmul.f32 %v1464_v36, %v919_v56  ;;  %v1466_v6 = vpop.eup %1465 }
 0x552   : > { %v591_v8 = vmul.f32 %v1466_v6, %v2111_v50 }
 0x553   : > { %1108 = vrot.lane.b32.xlu2 %v1087_v57, %s1703_s6  ;;  %1100 = vrot.lane.b32.xlu0 %v923_v58, %s1705_s10 }
 0x561   : > { %v1091_v2 = vpop.permute.xlu1 %1090 }
 0x562   : > { %v1112_v3 = vsel %vm503_vm1, %v590_v44, %v1091_v2 }
 0x569   : > { %v1093_v7 = vpop.permute.xlu1 %1092 }
 0x56a   : > { %v1113_v9 = vsel %vm503_vm1, %v591_v8, %v1093_v7 }
 0x59a   : > { %v1107_v5 = vpop.permute.xlu0 %1106 }
 0x5a5   : > { %v1099_v4 = vpop.permute.xlu2 %1098 }
 0x5a6   : > { %v1115_v32 = vsel %vm1114_vm2, %v1112_v3, %v1099_v4 }
 0x5a7   : > { %v1118_v33 = vsel %vm1117_vm3, %v1115_v32, %v1107_v5 }
 0x5a8   : > { %1136 = vmatmul.f32.vlgmr.msrb.gmra.mxu3 %v1118_v33 }
 0x5ad   : > { %v1109_v11 = vpop.permute.xlu2 %1108 }
 0x5c5   : > { %v1101_v10 = vpop.permute.xlu0 %1100 }
 0x5c6   : > { %v1116_v12 = vsel %vm1114_vm2, %v1113_v9, %v1101_v10 }
 0x5c7   : > { %v1119_v34 = vsel %vm1117_vm3, %v1116_v12, %v1109_v11 }
 0x5c8   : > { %1139 = vmatmul.f32.gmra.mxu3 %v1119_v34 }
 0x62b   : > { %v1137_v13 = vpop.f32.mrf.mxu3 }
 0x62c   : > { %1143 = vst [vmem:[%s310_s16] sm:$0xff] %v1137_v13 }
 0x64b   : > { %v1140_v50 = vpop.f32.mrf.mxu3 }
 0x64c   : > { %1144 = vst [vmem:[%s310_s16 + $0x8] sm:$0xff] %v1140_v50 }
 0x64d   : > { %1644 = shalt.err (!%p1641_p10)
}
 0x64e   : > { %s1706_s28 = smov 128   ;;  %s1707_s10 = smov 8  }
 0x64f   : > { %1340 = dma.vmem_to_hbm [thread:$0]  (%p1834_p3), %s1159_s13, 256, %s1161_s17, %s1146_s24, %s1706_s28, %s1706_s28, %s1707_s10  }
 0x650 PF: > { %s1175_s16 = sand.u32 1, %s1679_s18   ;;  %p2197_p12 = scmp.ge.s32.totalorder %s1691_s21, 2 }
 0x651   : > { %s1176_s23 = scalar_lea.sflag [#allocation4], %s1175_s16 }
 0x652   : > { %p1360_p13 = pnand %p2197_p12, %p1773_p6 }
 0x654   : > { %p1361_p0 = pneg %p1360_p13 }
 0x656   : > { %1674 = dma.done.wait (%p1361_p0), %s1176_s23, 256  }
 0x657   : > { %1676 = vsyncadd (%p1361_p0), %s1176_s23, 4294967040  ;;  %p20_p5 = scmp.ge.s32.totalorder %s1824_s9, 4   ;;  %s2198_s18 = smov %s1683_s19 }
 0x658   : > { %s2199_s19 = smov %s1687_s20  ;;  %s2200_s20 = smov %s1840_s15 }
 0x659   : > { %s2201_s21 = smov %s1824_s9  ;;  %22 = sbr.rel (!%p20_p5) target bundleno = 7 (0x7), region = 101 }
 0x65e   :  { %1182 = vsyncpa [#allocation3], 1 }
 0x65f   :  { %1184 = vsyncpa [#allocation3 + $0x1], 1 }
 0x660   :  { %1185 = vsyncpa [#allocation6], 1 }
 0x661   :  { %1186 = vsyncpa [#allocation9], 1 }
 0x662   :  { %1187 = vsyncpa [#allocation4], 1 }
 0x663   :  { %1189 = vsyncpa [#allocation4 + $0x1], 1 }

</bundles_post_ra>
